<compile_context>
chip_gen: v5e
topology: v5e:2x2
jax: 0.10.0
libtpu: 0.0.40
codegen_flags: <defaults>
</compile_context>

<pallas_src>
import jax
import jax.numpy as jnp
from jax.experimental import pallas as pl
from jax.experimental.pallas import tpu as pltpu

LANE = 128


def _round_up(x, m):
    return ((x + m - 1) // m) * m


def merge_layer_kernel(x1_ref, x2_ref, w1a_ref, w1b_ref, b1_ref, w2_ref,
                       b2_ref, o_ref):
    # fc1 on the implicit concat: cat(x1, x2) @ W1 == x1 @ W1a + x2 @ W1b
    h = jnp.dot(x1_ref[...], w1a_ref[...], preferred_element_type=jnp.float32)
    h = h + jnp.dot(x2_ref[...], w1b_ref[...],
                    preferred_element_type=jnp.float32)
    h = h + b1_ref[...]                 # (1, d3) broadcasts over batch tile
    h = jnp.maximum(h, 0.0)             # ReLU in f32
    # fc2
    y = jnp.dot(h.astype(w2_ref.dtype), w2_ref[...],
                preferred_element_type=jnp.float32)
    y = y + b2_ref[...]                 # (1, d4s)
    o_ref[...] = y.astype(o_ref.dtype)


def prepare_params(w1, b1, w2, b2, dim1, *, compute_dtype=None):
    """One-time parameter prep (call once, reuse across forward calls).

    w1: (dim1+dim2, dim3) pre-transposed fc1 weight; w2: (dim3, dim4).
    Splits W1 at the concat boundary, optionally casts MXU operands to
    `compute_dtype` (e.g. bf16 on v6e/v7x; halves HBM/VMEM weight traffic),
    keeps biases f32, and pads the output dim to a 128-lane multiple only
    when d4 > 128 (padding a tiny d4 would inflate the output writeback).
    """
    d4 = w2.shape[1]
    w1a, w1b = w1[:dim1], w1[dim1:]
    if compute_dtype is not None:
        w1a = w1a.astype(compute_dtype)
        w1b = w1b.astype(compute_dtype)
        w2 = w2.astype(compute_dtype)
    b1_2d = b1.astype(jnp.float32).reshape(1, -1)
    b2_2d = b2.astype(jnp.float32).reshape(1, -1)
    if d4 > LANE and d4 % LANE != 0:
        d4p = _round_up(d4, LANE)
        w2 = jnp.pad(w2, ((0, 0), (0, d4p - d4)))
        b2_2d = jnp.pad(b2_2d, ((0, 0), (0, d4p - d4)))
    return {"w1a": w1a, "w1b": w1b, "b1": b1_2d, "w2": w2, "b2": b2_2d,
            "d4": d4, "compute_dtype": compute_dtype}


def _choose_batch_tile(B, block_b, bytes_per_step, resident_bytes,
                       budget_bytes=48 * 2**20):
    """Pick a batch tile TB (multiple of 8) and padded batch Bp (multiple of TB)."""
    B8 = _round_up(B, 8)                      # never pad by more than 7 rows here
    TB = max(8, min((block_b // 8) * 8, B8))
    # Ensure >=2 grid steps when the batch allows it so dimension_semantics
    # ("parallel",) can shard the grid across v7x's two TensorCores.
    if B8 >= 16 and TB >= B8:
        TB = _round_up((B8 + 1) // 2, 8)
    # Shrink the tile if resident weights + pipelined tiles would blow VMEM
    # (64 MiB/TC on v7x; weights are replicated into both TCs under megacore).
    while TB > 8 and resident_bytes + bytes_per_step(TB) > budget_bytes:
        TB = max(8, ((TB // 2) // 8) * 8)
    Bp = _round_up(B, TB)
    return TB, Bp


def merge_layer(x1, x2, params, *, block_b=512):
    """MergeLayer forward: fc2(relu(fc1(cat([x1, x2], dim=1))))."""
    w1a, w1b = params["w1a"], params["w1b"]
    b1, w2, b2 = params["b1"], params["w2"], params["b2"]
    d4 = params["d4"]
    compute_dtype = params["compute_dtype"]

    B, d1 = x1.shape
    d2 = x2.shape[1]
    d3 = w1a.shape[1]
    d4s = w2.shape[1]                     # stored (possibly lane-padded) out dim
    out_dtype = x1.dtype                  # captured before any compute cast

    if compute_dtype is not None:
        x1 = x1.astype(compute_dtype)
        x2 = x2.astype(compute_dtype)

    in_item = x1.dtype.itemsize
    w_item = w1a.dtype.itemsize
    out_item = jnp.dtype(out_dtype).itemsize

    # Resident (single-buffered) weights + biases.
    resident = ((w1a.size + w1b.size + w2.size) * w_item
                + (b1.size + b2.size) * 4)

    def bytes_per_step(tb):
        # Double-buffered activation tiles + double-buffered output tile.
        return 2 * tb * (d1 + d2) * in_item + 2 * tb * d4s * out_item

    TB, Bp = _choose_batch_tile(B, block_b, bytes_per_step, resident)
    if Bp != B:
        x1 = jnp.pad(x1, ((0, Bp - B), (0, 0)))
        x2 = jnp.pad(x2, ((0, Bp - B), (0, 0)))

    needed = resident + bytes_per_step(TB)
    # Default scoped limits (16 MiB v5e / 32 MiB v6e,v7x) are far below
    # physical; raise explicitly but stay under v7x's 64 MiB per TC.
    vmem_limit = int(min(60 * 2**20, max(32 * 2**20, 2 * needed)))

    def build(single_buffer_weights):
        wkw = {}
        if single_buffer_weights and hasattr(pl, "Buffered"):
            # Constant-index blocks: single-buffer to halve resident footprint.
            wkw = dict(pipeline_mode=pl.Buffered(1))
        in_specs = [
            pl.BlockSpec((TB, d1), lambda i: (i, 0)),          # x1 tile (pipelined)
            pl.BlockSpec((TB, d2), lambda i: (i, 0)),          # x2 tile (pipelined)
            pl.BlockSpec((d1, d3), lambda i: (0, 0), **wkw),   # W1[:d1] resident
            pl.BlockSpec((d2, d3), lambda i: (0, 0), **wkw),   # W1[d1:] resident
            pl.BlockSpec((1, d3), lambda i: (0, 0), **wkw),    # b1 resident
            pl.BlockSpec((d3, d4s), lambda i: (0, 0), **wkw),  # W2 resident
            pl.BlockSpec((1, d4s), lambda i: (0, 0), **wkw),   # b2 resident
        ]
        return pl.pallas_call(
            merge_layer_kernel,
            out_shape=jax.ShapeDtypeStruct((Bp, d4s), out_dtype),
            grid=(Bp // TB,),
            in_specs=in_specs,
            out_specs=pl.BlockSpec((TB, d4s), lambda i: (i, 0)),
            compiler_params=pltpu.CompilerParams(
                dimension_semantics=("parallel",),
                vmem_limit_bytes=vmem_limit),
        )

    args = (x1, x2, w1a, w1b, b1, w2, b2)
    try:
        out = build(True)(*args)
    except Exception:
        # Fallback if this JAX build rejects single-buffered block specs.
        out = build(False)(*args)

    # Slice away batch padding / any lane padding outside the kernel.
    return out[:B, :d4]


def init_params(key, dim1, dim2, dim3, dim4, dtype=jnp.float32):
    """Synthetic init matching MergeLayer.__init__: xavier-normal weights
    (returned pre-transposed to (in, out)), PyTorch-default uniform biases."""
    k1, k2, k3, k4 = jax.random.split(key, 4)
    fan_in1, fan_out1 = dim1 + dim2, dim3
    fan_in2, fan_out2 = dim3, dim4
    std1 = (2.0 / (fan_in1 + fan_out1)) ** 0.5
    std2 = (2.0 / (fan_in2 + fan_out2)) ** 0.5
    w1 = (std1 * jax.random.normal(k1, (fan_in1, fan_out1))).astype(dtype)
    w2 = (std2 * jax.random.normal(k2, (fan_in2, fan_out2))).astype(dtype)
    bnd1 = 1.0 / (fan_in1 ** 0.5)
    bnd2 = 1.0 / (fan_in2 ** 0.5)
    b1 = jax.random.uniform(k3, (dim3,), minval=-bnd1, maxval=bnd1).astype(dtype)
    b2 = jax.random.uniform(k4, (dim4,), minval=-bnd2, maxval=bnd2).astype(dtype)
    return w1, b1, w2, b2


if __name__ == "__main__":
    # Small shapes consistent with MergeLayer(dim1, dim2, dim3, dim4).
    # B=10 / dim1=36 deliberately exercise batch padding and a d1 that is not
    # a multiple of 8 (handled by the pre-split W1).
    B, dim1, dim2, dim3, dim4 = 10, 36, 28, 64, 16

    key = jax.random.PRNGKey(0)
    kx1, kx2, kp = jax.random.split(key, 3)
    x1 = jax.random.normal(kx1, (B, dim1), dtype=jnp.float32)
    x2 = jax.random.normal(kx2, (B, dim2), dtype=jnp.float32)
    w1, b1, w2, b2 = init_params(kp, dim1, dim2, dim3, dim4)

    # Reference in plain JAX (same math as the PyTorch forward).
    x = jnp.concatenate([x1, x2], axis=1)
    ref = jnp.maximum(x @ w1 + b1, 0.0) @ w2 + b2

    # f32 path.
    params = prepare_params(w1, b1, w2, b2, dim1)
    out = jax.block_until_ready(merge_layer(x1, x2, params))
    assert out.shape == (B, dim4)
    assert jnp.allclose(out, ref, atol=2e-5, rtol=2e-5), \
        float(jnp.max(jnp.abs(out - ref)))

    # bf16 storage/compute path (f32 accumulation) -- loose tolerance.
    params_bf16 = prepare_params(w1, b1, w2, b2, dim1,
                                 compute_dtype=jnp.bfloat16)
    out_bf16 = jax.block_until_ready(merge_layer(x1, x2, params_bf16))
    assert out_bf16.shape == (B, dim4)
    assert float(jnp.max(jnp.abs(out_bf16 - ref))) < 0.3

    print("KERNEL_OK")
</pallas_src>

<mosaic_0001>
module attributes {stable_mosaic.version = 11 : i64} {
  func.func @merge_layer_kernel(%arg0: i32, %arg1: memref<8x36xf32, #tpu.memory_space<vmem>>, %arg2: memref<8x28xf32, #tpu.memory_space<vmem>>, %arg3: memref<36x64xf32, #tpu.memory_space<vmem>>, %arg4: memref<28x64xf32, #tpu.memory_space<vmem>>, %arg5: memref<1x64xf32, #tpu.memory_space<vmem>>, %arg6: memref<64x16xf32, #tpu.memory_space<vmem>>, %arg7: memref<1x16xf32, #tpu.memory_space<vmem>>, %arg8: memref<8x16xf32, #tpu.memory_space<vmem>>) attributes {dimension_semantics = [#tpu.dimension_semantics<parallel>], iteration_bounds = array<i64: 2>, scalar_prefetch = 0 : i64, scratch_operands = 0 : i64, tpu.core_type = #tpu.core_type<tc>, window_params = [{transform_indices = @transform_0, window_bounds = array<i64: 8, 36>}, {transform_indices = @transform_1, window_bounds = array<i64: 8, 28>}, {pipeline_mode = #tpu.pipeline_mode<synchronous>, transform_indices = @transform_2, window_bounds = array<i64: 36, 64>}, {pipeline_mode = #tpu.pipeline_mode<synchronous>, transform_indices = @transform_3, window_bounds = array<i64: 28, 64>}, {pipeline_mode = #tpu.pipeline_mode<synchronous>, transform_indices = @transform_4, window_bounds = array<i64: 1, 64>}, {pipeline_mode = #tpu.pipeline_mode<synchronous>, transform_indices = @transform_5, window_bounds = array<i64: 64, 16>}, {pipeline_mode = #tpu.pipeline_mode<synchronous>, transform_indices = @transform_6, window_bounds = array<i64: 1, 16>}, {transform_indices = @transform_7, window_bounds = array<i64: 8, 16>}]} {
    %c0 = arith.constant 0 : index
    %c0_0 = arith.constant 0 : index
    %0 = vector.load %arg1[%c0, %c0_0] : memref<8x36xf32, #tpu.memory_space<vmem>>, vector<8x36xf32>
    %c0_1 = arith.constant 0 : index
    %c0_2 = arith.constant 0 : index
    %1 = vector.load %arg3[%c0_1, %c0_2] : memref<36x64xf32, #tpu.memory_space<vmem>>, vector<36x64xf32>
    %cst = arith.constant dense<0.000000e+00> : vector<8x64xf32>
    %2 = tpu.matmul %0, %1, %cst {dimension_numbers = #tpu.dot_dimension_numbers<[1], [0], [0], [1], [0, 0, 1, 1], [], []>} : vector<8x36xf32>, vector<36x64xf32>, vector<8x64xf32> -> vector<8x64xf32>
    %c0_3 = arith.constant 0 : index
    %c0_4 = arith.constant 0 : index
    %3 = vector.load %arg2[%c0_3, %c0_4] : memref<8x28xf32, #tpu.memory_space<vmem>>, vector<8x28xf32>
    %c0_5 = arith.constant 0 : index
    %c0_6 = arith.constant 0 : index
    %4 = vector.load %arg4[%c0_5, %c0_6] : memref<28x64xf32, #tpu.memory_space<vmem>>, vector<28x64xf32>
    %cst_7 = arith.constant dense<0.000000e+00> : vector<8x64xf32>
    %5 = tpu.matmul %3, %4, %cst_7 {dimension_numbers = #tpu.dot_dimension_numbers<[1], [0], [0], [1], [0, 0, 1, 1], [], []>} : vector<8x28xf32>, vector<28x64xf32>, vector<8x64xf32> -> vector<8x64xf32>
    %6 = arith.addf %2, %5 : vector<8x64xf32>
    %c0_8 = arith.constant 0 : index
    %c0_9 = arith.constant 0 : index
    %7 = vector.load %arg5[%c0_8, %c0_9] : memref<1x64xf32, #tpu.memory_space<vmem>>, vector<1x64xf32>
    %8 = vector.broadcast %7 : vector<1x64xf32> to vector<8x64xf32>
    %9 = arith.addf %6, %8 : vector<8x64xf32>
    %cst_10 = arith.constant 0.000000e+00 : f32
    %10 = vector.broadcast %cst_10 : f32 to vector<8x64xf32>
    %11 = arith.maximumf %9, %10 : vector<8x64xf32>
    %c0_11 = arith.constant 0 : index
    %c0_12 = arith.constant 0 : index
    %12 = vector.load %arg6[%c0_11, %c0_12] : memref<64x16xf32, #tpu.memory_space<vmem>>, vector<64x16xf32>
    %cst_13 = arith.constant dense<0.000000e+00> : vector<8x16xf32>
    %13 = tpu.matmul %11, %12, %cst_13 {dimension_numbers = #tpu.dot_dimension_numbers<[1], [0], [0], [1], [0, 0, 1, 1], [], []>} : vector<8x64xf32>, vector<64x16xf32>, vector<8x16xf32> -> vector<8x16xf32>
    %c0_14 = arith.constant 0 : index
    %c0_15 = arith.constant 0 : index
    %14 = vector.load %arg7[%c0_14, %c0_15] : memref<1x16xf32, #tpu.memory_space<vmem>>, vector<1x16xf32>
    %15 = vector.broadcast %14 : vector<1x16xf32> to vector<8x16xf32>
    %16 = arith.addf %13, %15 : vector<8x16xf32>
    %c0_16 = arith.constant 0 : index
    %c0_17 = arith.constant 0 : index
    %17 = vector.load %arg8[%c0_16, %c0_17] : memref<8x16xf32, #tpu.memory_space<vmem>>, vector<8x16xf32>
    tpu.vector_store %arg8[%c0_16, %c0_17], %16 {strides = array<i32>} : memref<8x16xf32, #tpu.memory_space<vmem>>, vector<8x16xf32>,
    return
  }
  func.func @transform_0(%arg0: i32) -> (i32, i32) {
    %c0_i32 = arith.constant 0 : i32
    %c0_i32_0 = arith.constant 0 : i32
    return %arg0, %c0_i32 : i32, i32
  }
  func.func @transform_1(%arg0: i32) -> (i32, i32) {
    %c0_i32 = arith.constant 0 : i32
    %c0_i32_0 = arith.constant 0 : i32
    return %arg0, %c0_i32 : i32, i32
  }
  func.func @transform_2(%arg0: i32) -> (i32, i32) {
    %c0_i32 = arith.constant 0 : i32
    %c0_i32_0 = arith.constant 0 : i32
    %c0_i32_1 = arith.constant 0 : i32
    return %c0_i32, %c0_i32_0 : i32, i32
  }
  func.func @transform_3(%arg0: i32) -> (i32, i32) {
    %c0_i32 = arith.constant 0 : i32
    %c0_i32_0 = arith.constant 0 : i32
    %c0_i32_1 = arith.constant 0 : i32
    return %c0_i32, %c0_i32_0 : i32, i32
  }
  func.func @transform_4(%arg0: i32) -> (i32, i32) {
    %c0_i32 = arith.constant 0 : i32
    %c0_i32_0 = arith.constant 0 : i32
    %c0_i32_1 = arith.constant 0 : i32
    return %c0_i32, %c0_i32_0 : i32, i32
  }
  func.func @transform_5(%arg0: i32) -> (i32, i32) {
    %c0_i32 = arith.constant 0 : i32
    %c0_i32_0 = arith.constant 0 : i32
    %c0_i32_1 = arith.constant 0 : i32
    return %c0_i32, %c0_i32_0 : i32, i32
  }
  func.func @transform_6(%arg0: i32) -> (i32, i32) {
    %c0_i32 = arith.constant 0 : i32
    %c0_i32_0 = arith.constant 0 : i32
    %c0_i32_1 = arith.constant 0 : i32
    return %c0_i32, %c0_i32_0 : i32, i32
  }
  func.func @transform_7(%arg0: i32) -> (i32, i32) {
    %c0_i32 = arith.constant 0 : i32
    %c0_i32_0 = arith.constant 0 : i32
    return %arg0, %c0_i32 : i32, i32
  }
}

module attributes {stable_mosaic.version = 11 : i64} {
  func.func @merge_layer_kernel(%arg0: i32, %arg1: memref<8x36xf32, #tpu.memory_space<vmem>>, %arg2: memref<8x28xf32, #tpu.memory_space<vmem>>, %arg3: memref<36x64xf32, #tpu.memory_space<vmem>>, %arg4: memref<28x64xf32, #tpu.memory_space<vmem>>, %arg5: memref<1x64xf32, #tpu.memory_space<vmem>>, %arg6: memref<64x16xf32, #tpu.memory_space<vmem>>, %arg7: memref<1x16xf32, #tpu.memory_space<vmem>>, %arg8: memref<8x16xf32, #tpu.memory_space<vmem>>) attributes {dimension_semantics = [#tpu.dimension_semantics<parallel>], iteration_bounds = array<i64: 2>, scalar_prefetch = 0 : i64, scratch_operands = 0 : i64, tpu.core_type = #tpu.core_type<tc>, window_params = [{transform_indices = @transform_0, window_bounds = array<i64: 8, 36>}, {transform_indices = @transform_1, window_bounds = array<i64: 8, 28>}, {pipeline_mode = #tpu.pipeline_mode<synchronous>, transform_indices = @transform_2, window_bounds = array<i64: 36, 64>}, {pipeline_mode = #tpu.pipeline_mode<synchronous>, transform_indices = @transform_3, window_bounds = array<i64: 28, 64>}, {pipeline_mode = #tpu.pipeline_mode<synchronous>, transform_indices = @transform_4, window_bounds = array<i64: 1, 64>}, {pipeline_mode = #tpu.pipeline_mode<synchronous>, transform_indices = @transform_5, window_bounds = array<i64: 64, 16>}, {pipeline_mode = #tpu.pipeline_mode<synchronous>, transform_indices = @transform_6, window_bounds = array<i64: 1, 16>}, {transform_indices = @transform_7, window_bounds = array<i64: 8, 16>}]} {
    %c0 = arith.constant 0 : index
    %c0_0 = arith.constant 0 : index
    %0 = vector.load %arg1[%c0, %c0_0] : memref<8x36xf32, #tpu.memory_space<vmem>>, vector<8x36xf32>
    %c0_1 = arith.constant 0 : index
    %c0_2 = arith.constant 0 : index
    %1 = vector.load %arg3[%c0_1, %c0_2] : memref<36x64xf32, #tpu.memory_space<vmem>>, vector<36x64xf32>
    %cst = arith.constant dense<0.000000e+00> : vector<8x64xf32>
    %2 = tpu.matmul %0, %1, %cst {dimension_numbers = #tpu.dot_dimension_numbers<[1], [0], [0], [1], [0, 0, 1, 1], [], []>} : vector<8x36xf32>, vector<36x64xf32>, vector<8x64xf32> -> vector<8x64xf32>
    %c0_3 = arith.constant 0 : index
    %c0_4 = arith.constant 0 : index
    %3 = vector.load %arg2[%c0_3, %c0_4] : memref<8x28xf32, #tpu.memory_space<vmem>>, vector<8x28xf32>
    %c0_5 = arith.constant 0 : index
    %c0_6 = arith.constant 0 : index
    %4 = vector.load %arg4[%c0_5, %c0_6] : memref<28x64xf32, #tpu.memory_space<vmem>>, vector<28x64xf32>
    %cst_7 = arith.constant dense<0.000000e+00> : vector<8x64xf32>
    %5 = tpu.matmul %3, %4, %cst_7 {dimension_numbers = #tpu.dot_dimension_numbers<[1], [0], [0], [1], [0, 0, 1, 1], [], []>} : vector<8x28xf32>, vector<28x64xf32>, vector<8x64xf32> -> vector<8x64xf32>
    %6 = arith.addf %2, %5 : vector<8x64xf32>
    %c0_8 = arith.constant 0 : index
    %c0_9 = arith.constant 0 : index
    %7 = vector.load %arg5[%c0_8, %c0_9] : memref<1x64xf32, #tpu.memory_space<vmem>>, vector<1x64xf32>
    %8 = vector.broadcast %7 : vector<1x64xf32> to vector<8x64xf32>
    %9 = arith.addf %6, %8 : vector<8x64xf32>
    %cst_10 = arith.constant 0.000000e+00 : f32
    %10 = vector.broadcast %cst_10 : f32 to vector<8x64xf32>
    %11 = arith.maximumf %9, %10 : vector<8x64xf32>
    %c0_11 = arith.constant 0 : index
    %c0_12 = arith.constant 0 : index
    %12 = vector.load %arg6[%c0_11, %c0_12] : memref<64x16xf32, #tpu.memory_space<vmem>>, vector<64x16xf32>
    %cst_13 = arith.constant dense<0.000000e+00> : vector<8x16xf32>
    %13 = tpu.matmul %11, %12, %cst_13 {dimension_numbers = #tpu.dot_dimension_numbers<[1], [0], [0], [1], [0, 0, 1, 1], [], []>} : vector<8x64xf32>, vector<64x16xf32>, vector<8x16xf32> -> vector<8x16xf32>
    %c0_14 = arith.constant 0 : index
    %c0_15 = arith.constant 0 : index
    %14 = vector.load %arg7[%c0_14, %c0_15] : memref<1x16xf32, #tpu.memory_space<vmem>>, vector<1x16xf32>
    %15 = vector.broadcast %14 : vector<1x16xf32> to vector<8x16xf32>
    %16 = arith.addf %13, %15 : vector<8x16xf32>
    %c0_16 = arith.constant 0 : index
    %c0_17 = arith.constant 0 : index
    %17 = vector.load %arg8[%c0_16, %c0_17] : memref<8x16xf32, #tpu.memory_space<vmem>>, vector<8x16xf32>
    tpu.vector_store %arg8[%c0_16, %c0_17], %16 {strides = array<i32>} : memref<8x16xf32, #tpu.memory_space<vmem>>, vector<8x16xf32>,
    return
  }
  func.func @transform_0(%arg0: i32) -> (i32, i32) {
    %c0_i32 = arith.constant 0 : i32
    %c0_i32_0 = arith.constant 0 : i32
    return %arg0, %c0_i32 : i32, i32
  }
  func.func @transform_1(%arg0: i32) -> (i32, i32) {
    %c0_i32 = arith.constant 0 : i32
    %c0_i32_0 = arith.constant 0 : i32
    return %arg0, %c0_i32 : i32, i32
  }
  func.func @transform_2(%arg0: i32) -> (i32, i32) {
    %c0_i32 = arith.constant 0 : i32
    %c0_i32_0 = arith.constant 0 : i32
    %c0_i32_1 = arith.constant 0 : i32
    return %c0_i32, %c0_i32_0 : i32, i32
  }
  func.func @transform_3(%arg0: i32) -> (i32, i32) {
    %c0_i32 = arith.constant 0 : i32
    %c0_i32_0 = arith.constant 0 : i32
    %c0_i32_1 = arith.constant 0 : i32
    return %c0_i32, %c0_i32_0 : i32, i32
  }
  func.func @transform_4(%arg0: i32) -> (i32, i32) {
    %c0_i32 = arith.constant 0 : i32
    %c0_i32_0 = arith.constant 0 : i32
    %c0_i32_1 = arith.constant 0 : i32
    return %c0_i32, %c0_i32_0 : i32, i32
  }
  func.func @transform_5(%arg0: i32) -> (i32, i32) {
    %c0_i32 = arith.constant 0 : i32
    %c0_i32_0 = arith.constant 0 : i32
    %c0_i32_1 = arith.constant 0 : i32
    return %c0_i32, %c0_i32_0 : i32, i32
  }
  func.func @transform_6(%arg0: i32) -> (i32, i32) {
    %c0_i32 = arith.constant 0 : i32
    %c0_i32_0 = arith.constant 0 : i32
    %c0_i32_1 = arith.constant 0 : i32
    return %c0_i32, %c0_i32_0 : i32, i32
  }
  func.func @transform_7(%arg0: i32) -> (i32, i32) {
    %c0_i32 = arith.constant 0 : i32
    %c0_i32_0 = arith.constant 0 : i32
    return %arg0, %c0_i32 : i32, i32
  }
}

</mosaic_0001>

<bundles_post_ra>
// kernel: tpu_custom_call.1
= control target key start
LH: loop header
LB: loop body
LE: loop exit
PB: predicated region body
PF: predicated region fallthrough
CT: control target
= control target key end

     0   :  { %s1023_s0 = inlined_call_operand.hbm [shape: f32[16,36], index: 0, kind: input, shape index: {}]   ;;  %s1024_s1 = inlined_call_operand.hbm [shape: f32[16,28], index: 1, kind: input, shape index: {}]   ;;  %s1025_s2 = inlined_call_operand.vmem [shape: f32[36,64], index: 2, kind: input, shape index: {}]   ;;  %s1026_s3 = inlined_call_operand.vmem [shape: f32[28,64], index: 3, kind: input, shape index: {}]   ;;  %s1027_s4 = inlined_call_operand.vmem [shape: f32[1,64], index: 4, kind: input, shape index: {}]   ;;  %s1028_s5 = inlined_call_operand.vmem [shape: f32[64,16], index: 5, kind: input, shape index: {}]   ;;  %s1029_s6 = inlined_call_operand.vmem [shape: f32[1,16], index: 6, kind: input, shape index: {}]   ;;  %s1030_s7 = inlined_call_operand.hbm [shape: f32[16,16], index: 7, kind: output, shape index: {}]  }
   0x1   :  { %1034 = sst [smem:[#allocation14_spill]] %s1023_s0 }
   0x2   :  { %12 = vsyncpa [#allocation3], 0 }
   0x3   :  { %14 = vsyncpa [#allocation3 + $0x1], 0 }
   0x4   :  { %15 = vsyncpa [#allocation6], 0 }
   0x5   :  { %17 = vsyncpa [#allocation6 + $0x1], 0 }
   0x6   :  { %18 = vsyncpa [#allocation4], 0 }
   0x7   :  { %20 = vsyncpa [#allocation4 + $0x1], 0  ;;  %s799_s24 = smov 0   ;;  %s801_s25 = smov 0  }
   0x8   :  { %s803_s26 = smov 0   ;;  %s805_s27 = smov 0  }
   0x9 LB: > { %1035 = sst [smem:[#allocation11_spill]] %s753_s26  ;;  %s820_s28 = sadd.s32 4294967295, %s757_s27   ;;  %s757_s27 = sphi %s805_s27, %s1046_s27   ;;  %s753_s26 = sphi %s803_s26, %s1048_s26   ;;  %s749_s25 = sphi %s801_s25, %s1050_s25   ;;  %s745_s24 = sphi %s799_s24, %s1049_s24  }
   0xa   : > { %s554_s29 = sadd.s32 4294967294, %s757_s27   ;;  %s824_s30 = sadd.s32 1, %s757_s27  }
   0xb   : > { %1036 = sst [smem:[#allocation12_spill]] %s824_s30  ;;  %s33_s8 = sadd.s32 1, %s753_s26 }
   0xc   : > { %s30_s9 = ssub.s32 %s757_s27, %s824_s30  ;;  %p40_p0 = scmp.ne.s32.totalorder %s753_s26, %s749_s25 }
   0xd   : > { %p31_p1 = scmp.eq.s32.totalorder %s30_s9, 0  ;;  %p41_p2 = scmp.eq.s32.totalorder %s757_s27, 0 }
   0xe   : > { %p46_p3 = scmp.ne.s32.totalorder %s749_s25, %s745_s24  ;;  %p47_p4 = scmp.eq.s32.totalorder %s820_s28, 0 }
   0xf   : > { %s836_s10 = scalar_select %p31_p1, %s753_s26, %s33_s8  }
  0x10   : > { %p838_p5 = por %p41_p2, %p40_p0  ;;  %p842_p6 = por %p47_p4, %p46_p3 }
  0x11   : > { %1037 = sst [smem:[#allocation13_spill]] %s836_s10  ;;  %p201_p7 = scmp.eq.s32.totalorder %s820_s28, 1 }
  0x12   : > { %p207_p8 = scmp.eq.s32.totalorder %s554_s29, 1  ;;  %p591_p10 = scmp.lt.s32.totalorder %s757_s27, 2 }
  0x13   : > { %p849_p11 = por %p201_p7, %p40_p0  ;;  %s858_s15 = sand.u32 1, %s753_s26  }
  0x14   : > { %p853_p12 = por %p207_p8, %p46_p3  ;;  %s558_s16 = sshll.u32 %s757_s27, 3 }
  0x15   : > { %s557_s17 = sshll.u32 %s858_s15, 3  ;;  %s1042_s0 = sld [smem:[#allocation14_spill]] }
  0x16   : > { %s246_s22 = scalar_lea.vmem [#allocation2], %s557_s17  ;;  %p867_p13 = pnand %p591_p10, %p838_p5 }
  0x17   : > { %s254_s23 = sshll.u32 %s246_s22, 4  ;;  %p561_p0 = scmp.ge.s32.totalorder %s757_s27, 1  ;;  %s255_s23 = int_to_ptr.vmem [resolvable:$true] %s254_s23 }
  0x18   : > { %p278_p1 = scmp.lt.s32.totalorder %s757_s27, 3  ;;  %s243_s8 = scalar_lea.sflag [#allocation3], %s858_s15 }
  0x19   : > { %p631_p3 = pneg %p867_p13 }
  0x1b   : > { %s250_s20 = scalar_lea.hbm %s1042_s0, %s558_s16  ;;  %s634_s19 = scalar_lea.hbm %s1042_s0, 16 }
  0x1c   : > { %s252_s21 = sshll.u32 %s250_s20, 4  ;;  %s253_s21 = int_to_ptr.hbm [resolvable:$true] %s252_s21 }
  0x1d   : > { %s627_s9 = sshra.s32 %s253_s21, 4  ;;  %s628_s9 = int_to_ptr.hbm [resolvable:$true] %s627_s9 }
  0x1e   : > { %s629_s10 = scalar_lea.hbm %s628_s9, 8  ;;  %p635_p5 = scmp.lt.s32.totalorder %s628_s9, %s1042_s0 }
  0x1f   : > { %p630_p2 = scmp.ne.s32.totalorder %s628_s9, %s629_s10  ;;  %p636_p8 = scmp.lt.s32.totalorder %s634_s19, %s629_s10 }
  0x21   : > { %p632_p4 = pnand %p631_p3, %p630_p2  ;;  %p637_p10 = por %p636_p8, %p635_p5 }
  0x23   : > { %p633_p7 = pneg %p632_p4 }
  0x25   : > { %p638_p9 = pnand %p637_p10, %p633_p7 }
  0x27   : > { %641 = shalt.err (!%p638_p9)
}
  0x28   : > { %583 = dma.hbm_to_vmem [thread:$0]  (!%p867_p13), %s253_s21, 128, %s255_s23, %s243_s8  }
  0x29   : > { %p891_p2 = pnand %p561_p0, %p278_p1  ;;  %s269_s10 = scalar_lea.hbm %s1024_s1, %s558_s16 }
  0x2a   : > { %s271_s9 = sshll.u32 %s269_s10, 4  ;;  %s265_s19 = scalar_lea.vmem [#allocation5], %s557_s17  ;;  %s272_s9 = int_to_ptr.hbm [resolvable:$true] %s271_s9 }
  0x2b   : > { %s273_s22 = sshll.u32 %s265_s19, 4  ;;  %s262_s0 = scalar_lea.sflag [#allocation6], %s858_s15  ;;  %s274_s22 = int_to_ptr.vmem [resolvable:$true] %s273_s22 }
  0x2c   : > { %s657_s26 = sshra.s32 %s272_s9, 4  ;;  %s664_s8 = scalar_lea.hbm %s1024_s1, 16  ;;  %s658_s26 = int_to_ptr.hbm [resolvable:$true] %s657_s26 }
  0x2d   : > { %s659_s30 = scalar_lea.hbm %s658_s26, 8  ;;  %p665_p4 = scmp.lt.s32.totalorder %s658_s26, %s1024_s1 }
  0x2e   : > { %p660_p9 = scmp.ne.s32.totalorder %s658_s26, %s659_s30  ;;  %p666_p7 = scmp.lt.s32.totalorder %s664_s8, %s659_s30 }
  0x30   : > { %p662_p0 = pnand %p660_p9, %p631_p3  ;;  %p667_p5 = por %p666_p7, %p665_p4 }
  0x32   : > { %p663_p1 = pneg %p662_p0 }
  0x34   : > { %p668_p8 = pnand %p667_p5, %p663_p1 }
  0x36   : > { %671 = shalt.err (!%p668_p8)
}
  0x37   : > { %586 = dma.hbm_to_vmem [thread:$0]  (!%p867_p13), %s272_s9, 128, %s274_s22, %s262_s0  }
  0x38   : > { %282 = sbr.rel (%p891_p2) target bundleno = 343 (0x157), region = 48  ;;  %s913_s15 = sand.u32 (!%p891_p2), 1, %s749_s25  }
  0x39   : > { %s916_s17 = sshll.u32 (!%p891_p2), %s913_s15, 3  ;;  %s285_s26 = scalar_lea.sflag (!%p891_p2), [#allocation3], %s913_s15 }
  0x3a   : > { %s288_s30 = scalar_lea.vmem (!%p891_p2), [#allocation2], %s916_s17 }
  0x3d   : > { %732 = dma.done.wait (%p842_p6), %s285_s26, 128  }
  0x3e   : > { %734 = vsyncadd (%p842_p6), %s285_s26, 4294967168  ;;  %s295_s0 = scalar_lea.sflag [#allocation6], %s913_s15  ;;  %s298_s29 = scalar_lea.vmem [#allocation5], %s916_s17 }
  0x3f   : > { %736 = dma.done.wait (%p842_p6), %s295_s0, 128  }
  0x40   : > { %738 = vsyncadd (%p842_p6), %s295_s0, 4294967168  ;;  %vm350_vm0 = vcmask 1043456   ;;  %v340_v0 = vld [vmem:[%s1025_s2 + $0x20] sm:$0xf]  ;;  %v345_v1 = vld [vmem:[%s1026_s3 + $0x18] sm:$0xf] }
  0x41   : > { %v339_v2 = vld [vmem:[%s1025_s2 + $0x18] sm:$0xff]  ;;  %567 = vmatpush.msk.msra.mxu1 %vm350_vm0, %v340_v0  ;;  %565 = vmatpush.msk.msra.mxu0 %vm350_vm0, %v345_v1  ;;  %v344_v3 = vld [vmem:[%s1026_s3 + $0x10] sm:$0xff]  ;;  %v343_v5 = vld [vmem:[%s1026_s3 + $0x8] sm:$0xff]  ;;  %vm346_vm1 = vcmask 228352   ;;  %vm374_vm2 = vcmask 293888   ;;  %vm419_vm3 = vcmask 523264  }
  0x42   : > { %v338_v4 = vld [vmem:[%s1025_s2 + $0x10] sm:$0xff]  ;;  %v337_v6 = vld [vmem:[%s1025_s2 + $0x8] sm:$0xff]  ;;  %v414_v7 = vld [vmem:[%s1028_s5 + $0x38] sm:$0xff]  ;;  %s571_s21 = sshll.u32 %s820_s28, 3  ;;  %s334_s16 = scalar_lea.vmem [#allocation7], %s916_s17  ;;  %vm443_vm4 = vcmask 130048  }
  0x43   : > { %393 = vmatpush.msra.mxu1 %v339_v2  ;;  %367 = vmatpush.msra.mxu0 %v344_v3  ;;  %v342_v8 = vld [vmem:[%s1026_s3] sm:$0xff]  ;;  %v341_v9 = vld [vmem:[%s298_s29] sm:$0xff]  ;;  %v412_v11 = vld [vmem:[%s1028_s5 + $0x28] sm:$0xff]  ;;  %s456_s8 = scalar_lea.hbm %s1030_s7, %s571_s21  ;;  %s458_s26 = sshll.u32 %s334_s16, 4  ;;  %s459_s26 = int_to_ptr.vmem [resolvable:$true] %s458_s26 }
  0x44   : > { %431 = vmatpush.msra.mxu2 %v414_v7  ;;  %v413_v10 = vld [vmem:[%s1028_s5 + $0x30] sm:$0xff]  ;;  %v336_v12 = vld [vmem:[%s1025_s2] sm:$0xff]  ;;  %v410_v15 = vld [vmem:[%s1028_s5 + $0x18] sm:$0xff]  ;;  %s460_s0 = sshll.u32 %s456_s8, 4  ;;  %s446_s11 = scalar_lea.sflag [#allocation4], %s913_s15  ;;  %s461_s0 = int_to_ptr.hbm [resolvable:$true] %s460_s0 }
  0x45   : > { %394 = vmatpush.msra.mxu1 %v338_v4  ;;  %368 = vmatpush.msra.mxu0 %v343_v5  ;;  %v335_v13 = vld [vmem:[%s288_s30] sm:$0xff]  ;;  %v409_v16 = vld [vmem:[%s1028_s5 + $0x10] sm:$0xff]  ;;  %s701_s28 = sshra.s32 %s461_s0, 4  ;;  %s707_s17 = scalar_lea.hbm %s1030_s7, 16  ;;  %s702_s28 = int_to_ptr.hbm [resolvable:$true] %s701_s28 }
  0x46   : > { %432 = vmatpush.msra.mxu2 %v413_v10  ;;  %v411_v14 = vld [vmem:[%s1028_s5 + $0x20] sm:$0xff]  ;;  %v408_v17 = vld [vmem:[%s1028_s5 + $0x8] sm:$0xff]  ;;  %s703_s30 = scalar_lea.hbm %s702_s28, 8  ;;  %p708_p10 = scmp.lt.s32.totalorder %s702_s28, %s1030_s7 }
  0x47   : > { %395 = vmatpush.msra.mxu1 %v337_v6  ;;  %369 = vmatpush.msra.mxu0 %v342_v8  ;;  %v407_v18 = vld [vmem:[%s1028_s5] sm:$0xff]  ;;  %p704_p6 = scmp.ne.s32.totalorder %s702_s28, %s703_s30  ;;  %p709_p2 = scmp.lt.s32.totalorder %s707_s17, %s703_s30 }
  0x48   : > { %566 = vmatmul.msk.f32.vlgmr.msra.gmra.mxu0 %vm346_vm1, %v341_v9  ;;  %433 = vmatpush.msra.mxu2 %v412_v11  ;;  %v625_v20 = vld [vmem:[%s1027_s4] ss:$0 sm:$0xff] }
  0x49   : > { %396 = vmatpush.msra.mxu1 %v336_v12  ;;  %v626_v25 = vld [vmem:[%s1029_s6] ss:$0 sm:$0xff]  ;;  %p705_p13 = pnand %p704_p6, %p849_p11  ;;  %p710_p9 = por %p709_p2, %p708_p10 }
  0x4a   : > { %568 = vmatmul.msk.f32.vlgmr.msra.gmra.mxu1 %vm374_vm2, %v335_v13  ;;  %434 = vmatpush.msra.mxu2 %v411_v14 }
  0x4b   : > { %p706_p3 = pneg %p705_p13 }
  0x4c   : > { %435 = vmatpush.msra.mxu2 %v410_v15 }
  0x4d   : > { %p711_p0 = pnand %p710_p9, %p706_p3 }
  0x4e   : > { %436 = vmatpush.msra.mxu2 %v409_v16 }
  0x50   : > { %437 = vmatpush.msra.mxu2 %v408_v17 }
  0x52   : > { %438 = vmatpush.msra.mxu2 %v407_v18 }
  0xc5   : > { %v371_v19 = vpop.f32.mrf.mxu0 }
  0xc7   : > { %v398_v21 = vpop.f32.mrf.mxu1 }
  0xc8   : > { %v399_v22 = vadd.f32 %v398_v21, %v371_v19 }
  0xca   : > { %v405_v23 = vadd.f32 %v625_v20, %v399_v22 }
  0xcc   : > { %v406_v24 = vmax.f32 %v405_v23, 0.0 }
  0xce   : > { %569 = vmatmul.msk.f32.vlgmr.msra.gmra.mxu2 %vm419_vm3, %v406_v24 }
 0x151   : > { %v440_v26 = vpop.f32.mrf.mxu2 }
 0x152   : > { %v441_v27 = vadd.f32 %v626_v25, %v440_v26 }
 0x154   : > { %444 = vst.msk [vmem:[%s334_s16] sm:$0xff] %vm443_vm4, %v441_v27 }
 0x155   : > { %714 = shalt.err (!%p711_p0)
}
 0x156   : > { %578 = dma.vmem_to_hbm [thread:$0]  (%p849_p11), %s459_s26, 128, %s461_s0, %s446_s11  }
 0x157 PF: > { %s472_s15 = sand.u32 1, %s745_s24   ;;  %p1045_p1 = scmp.ge.s32.totalorder %s757_s27, 2 }
 0x158   : > { %s473_s22 = scalar_lea.sflag [#allocation4], %s472_s15 }
 0x159   : > { %p588_p4 = pnand %p1045_p1, %p853_p12 }
 0x15b   : > { %p589_p7 = pneg %p588_p4 }
 0x15d   : > { %740 = dma.done.wait (%p589_p7), %s473_s22, 128  }
 0x15e   : > { %742 = vsyncadd (%p589_p7), %s473_s22, 4294967168  ;;  %s1046_s27 = sld [smem:[#allocation12_spill]]  ;;  %s1049_s24 = smov %s749_s25 }
 0x15f   : > { %s1047_s21 = sld [smem:[#allocation11_spill]] }
 0x160   : > { %s1048_s26 = sld [smem:[#allocation13_spill]] }
 0x164   : > { %p23_p5 = scmp.ge.s32.totalorder %s1046_s27, 4  }
 0x165   : > { %s1050_s25 = smov %s1047_s21 }
 0x166   :  { %25 = sbr.rel (!%p23_p5) target bundleno = 9 (0x9), region = 106 }
 0x16b   :  { %479 = vsyncpa [#allocation3], 1 }
 0x16c   :  { %481 = vsyncpa [#allocation3 + $0x1], 1 }
 0x16d   :  { %482 = vsyncpa [#allocation6], 1 }
 0x16e   :  { %484 = vsyncpa [#allocation6 + $0x1], 1 }
 0x16f   :  { %485 = vsyncpa [#allocation4], 1 }
 0x170   :  { %487 = vsyncpa [#allocation4 + $0x1], 1 }

// kernel: tpu_custom_call.1
= control target key start
LH: loop header
LB: loop body
LE: loop exit
PB: predicated region body
PF: predicated region fallthrough
CT: control target
= control target key end

     0   :  { %s1023_s0 = inlined_call_operand.hbm [shape: f32[16,36], index: 0, kind: input, shape index: {}]   ;;  %s1024_s1 = inlined_call_operand.hbm [shape: f32[16,28], index: 1, kind: input, shape index: {}]   ;;  %s1025_s2 = inlined_call_operand.vmem [shape: f32[36,64], index: 2, kind: input, shape index: {}]   ;;  %s1026_s3 = inlined_call_operand.vmem [shape: f32[28,64], index: 3, kind: input, shape index: {}]   ;;  %s1027_s4 = inlined_call_operand.vmem [shape: f32[1,64], index: 4, kind: input, shape index: {}]   ;;  %s1028_s5 = inlined_call_operand.vmem [shape: f32[64,16], index: 5, kind: input, shape index: {}]   ;;  %s1029_s6 = inlined_call_operand.vmem [shape: f32[1,16], index: 6, kind: input, shape index: {}]   ;;  %s1030_s7 = inlined_call_operand.hbm [shape: f32[16,16], index: 7, kind: output, shape index: {}]  }
   0x1   :  { %1034 = sst [smem:[#allocation14_spill]] %s1023_s0 }
   0x2   :  { %12 = vsyncpa [#allocation3], 0 }
   0x3   :  { %14 = vsyncpa [#allocation3 + $0x1], 0 }
   0x4   :  { %15 = vsyncpa [#allocation6], 0 }
   0x5   :  { %17 = vsyncpa [#allocation6 + $0x1], 0 }
   0x6   :  { %18 = vsyncpa [#allocation4], 0 }
   0x7   :  { %20 = vsyncpa [#allocation4 + $0x1], 0  ;;  %s799_s24 = smov 0   ;;  %s801_s25 = smov 0  }
   0x8   :  { %s803_s26 = smov 0   ;;  %s805_s27 = smov 0  }
   0x9 LB: > { %1035 = sst [smem:[#allocation11_spill]] %s753_s26  ;;  %s820_s28 = sadd.s32 4294967295, %s757_s27   ;;  %s757_s27 = sphi %s805_s27, %s1046_s27   ;;  %s753_s26 = sphi %s803_s26, %s1048_s26   ;;  %s749_s25 = sphi %s801_s25, %s1050_s25   ;;  %s745_s24 = sphi %s799_s24, %s1049_s24  }
   0xa   : > { %s554_s29 = sadd.s32 4294967294, %s757_s27   ;;  %s824_s30 = sadd.s32 1, %s757_s27  }
   0xb   : > { %1036 = sst [smem:[#allocation12_spill]] %s824_s30  ;;  %s33_s8 = sadd.s32 1, %s753_s26 }
   0xc   : > { %s30_s9 = ssub.s32 %s757_s27, %s824_s30  ;;  %p40_p0 = scmp.ne.s32.totalorder %s753_s26, %s749_s25 }
   0xd   : > { %p31_p1 = scmp.eq.s32.totalorder %s30_s9, 0  ;;  %p41_p2 = scmp.eq.s32.totalorder %s757_s27, 0 }
   0xe   : > { %p46_p3 = scmp.ne.s32.totalorder %s749_s25, %s745_s24  ;;  %p47_p4 = scmp.eq.s32.totalorder %s820_s28, 0 }
   0xf   : > { %s836_s10 = scalar_select %p31_p1, %s753_s26, %s33_s8  }
  0x10   : > { %p838_p5 = por %p41_p2, %p40_p0  ;;  %p842_p6 = por %p47_p4, %p46_p3 }
  0x11   : > { %1037 = sst [smem:[#allocation13_spill]] %s836_s10  ;;  %p201_p7 = scmp.eq.s32.totalorder %s820_s28, 1 }
  0x12   : > { %p207_p8 = scmp.eq.s32.totalorder %s554_s29, 1  ;;  %p591_p10 = scmp.lt.s32.totalorder %s757_s27, 2 }
  0x13   : > { %p849_p11 = por %p201_p7, %p40_p0  ;;  %s858_s15 = sand.u32 1, %s753_s26  }
  0x14   : > { %p853_p12 = por %p207_p8, %p46_p3  ;;  %s558_s16 = sshll.u32 %s757_s27, 3 }
  0x15   : > { %s557_s17 = sshll.u32 %s858_s15, 3  ;;  %s1042_s0 = sld [smem:[#allocation14_spill]] }
  0x16   : > { %s246_s22 = scalar_lea.vmem [#allocation2], %s557_s17  ;;  %p867_p13 = pnand %p591_p10, %p838_p5 }
  0x17   : > { %s254_s23 = sshll.u32 %s246_s22, 4  ;;  %p561_p0 = scmp.ge.s32.totalorder %s757_s27, 1  ;;  %s255_s23 = int_to_ptr.vmem [resolvable:$true] %s254_s23 }
  0x18   : > { %p278_p1 = scmp.lt.s32.totalorder %s757_s27, 3  ;;  %s243_s8 = scalar_lea.sflag [#allocation3], %s858_s15 }
  0x19   : > { %p631_p3 = pneg %p867_p13 }
  0x1b   : > { %s250_s20 = scalar_lea.hbm %s1042_s0, %s558_s16  ;;  %s634_s19 = scalar_lea.hbm %s1042_s0, 16 }
  0x1c   : > { %s252_s21 = sshll.u32 %s250_s20, 4  ;;  %s253_s21 = int_to_ptr.hbm [resolvable:$true] %s252_s21 }
  0x1d   : > { %s627_s9 = sshra.s32 %s253_s21, 4  ;;  %s628_s9 = int_to_ptr.hbm [resolvable:$true] %s627_s9 }
  0x1e   : > { %s629_s10 = scalar_lea.hbm %s628_s9, 8  ;;  %p635_p5 = scmp.lt.s32.totalorder %s628_s9, %s1042_s0 }
  0x1f   : > { %p630_p2 = scmp.ne.s32.totalorder %s628_s9, %s629_s10  ;;  %p636_p8 = scmp.lt.s32.totalorder %s634_s19, %s629_s10 }
  0x21   : > { %p632_p4 = pnand %p631_p3, %p630_p2  ;;  %p637_p10 = por %p636_p8, %p635_p5 }
  0x23   : > { %p633_p7 = pneg %p632_p4 }
  0x25   : > { %p638_p9 = pnand %p637_p10, %p633_p7 }
  0x27   : > { %641 = shalt.err (!%p638_p9)
}
  0x28   : > { %583 = dma.hbm_to_vmem [thread:$0]  (!%p867_p13), %s253_s21, 128, %s255_s23, %s243_s8  }
  0x29   : > { %p891_p2 = pnand %p561_p0, %p278_p1  ;;  %s269_s10 = scalar_lea.hbm %s1024_s1, %s558_s16 }
  0x2a   : > { %s271_s9 = sshll.u32 %s269_s10, 4  ;;  %s265_s19 = scalar_lea.vmem [#allocation5], %s557_s17  ;;  %s272_s9 = int_to_ptr.hbm [resolvable:$true] %s271_s9 }
  0x2b   : > { %s273_s22 = sshll.u32 %s265_s19, 4  ;;  %s262_s0 = scalar_lea.sflag [#allocation6], %s858_s15  ;;  %s274_s22 = int_to_ptr.vmem [resolvable:$true] %s273_s22 }
  0x2c   : > { %s657_s26 = sshra.s32 %s272_s9, 4  ;;  %s664_s8 = scalar_lea.hbm %s1024_s1, 16  ;;  %s658_s26 = int_to_ptr.hbm [resolvable:$true] %s657_s26 }
  0x2d   : > { %s659_s30 = scalar_lea.hbm %s658_s26, 8  ;;  %p665_p4 = scmp.lt.s32.totalorder %s658_s26, %s1024_s1 }
  0x2e   : > { %p660_p9 = scmp.ne.s32.totalorder %s658_s26, %s659_s30  ;;  %p666_p7 = scmp.lt.s32.totalorder %s664_s8, %s659_s30 }
  0x30   : > { %p662_p0 = pnand %p660_p9, %p631_p3  ;;  %p667_p5 = por %p666_p7, %p665_p4 }
  0x32   : > { %p663_p1 = pneg %p662_p0 }
  0x34   : > { %p668_p8 = pnand %p667_p5, %p663_p1 }
  0x36   : > { %671 = shalt.err (!%p668_p8)
}
  0x37   : > { %586 = dma.hbm_to_vmem [thread:$0]  (!%p867_p13), %s272_s9, 128, %s274_s22, %s262_s0  }
  0x38   : > { %282 = sbr.rel (%p891_p2) target bundleno = 343 (0x157), region = 48  ;;  %s913_s15 = sand.u32 (!%p891_p2), 1, %s749_s25  }
  0x39   : > { %s916_s17 = sshll.u32 (!%p891_p2), %s913_s15, 3  ;;  %s285_s26 = scalar_lea.sflag (!%p891_p2), [#allocation3], %s913_s15 }
  0x3a   : > { %s288_s30 = scalar_lea.vmem (!%p891_p2), [#allocation2], %s916_s17 }
  0x3d   : > { %732 = dma.done.wait (%p842_p6), %s285_s26, 128  }
  0x3e   : > { %734 = vsyncadd (%p842_p6), %s285_s26, 4294967168  ;;  %s295_s0 = scalar_lea.sflag [#allocation6], %s913_s15  ;;  %s298_s29 = scalar_lea.vmem [#allocation5], %s916_s17 }
  0x3f   : > { %736 = dma.done.wait (%p842_p6), %s295_s0, 128  }
  0x40   : > { %738 = vsyncadd (%p842_p6), %s295_s0, 4294967168  ;;  %vm350_vm0 = vcmask 1043456   ;;  %v340_v0 = vld [vmem:[%s1025_s2 + $0x20] sm:$0xf]  ;;  %v345_v1 = vld [vmem:[%s1026_s3 + $0x18] sm:$0xf] }
  0x41   : > { %v339_v2 = vld [vmem:[%s1025_s2 + $0x18] sm:$0xff]  ;;  %567 = vmatpush.msk.msra.mxu1 %vm350_vm0, %v340_v0  ;;  %565 = vmatpush.msk.msra.mxu0 %vm350_vm0, %v345_v1  ;;  %v344_v3 = vld [vmem:[%s1026_s3 + $0x10] sm:$0xff]  ;;  %v343_v5 = vld [vmem:[%s1026_s3 + $0x8] sm:$0xff]  ;;  %vm346_vm1 = vcmask 228352   ;;  %vm374_vm2 = vcmask 293888   ;;  %vm419_vm3 = vcmask 523264  }
  0x42   : > { %v338_v4 = vld [vmem:[%s1025_s2 + $0x10] sm:$0xff]  ;;  %v337_v6 = vld [vmem:[%s1025_s2 + $0x8] sm:$0xff]  ;;  %v414_v7 = vld [vmem:[%s1028_s5 + $0x38] sm:$0xff]  ;;  %s571_s21 = sshll.u32 %s820_s28, 3  ;;  %s334_s16 = scalar_lea.vmem [#allocation7], %s916_s17  ;;  %vm443_vm4 = vcmask 130048  }
  0x43   : > { %393 = vmatpush.msra.mxu1 %v339_v2  ;;  %367 = vmatpush.msra.mxu0 %v344_v3  ;;  %v342_v8 = vld [vmem:[%s1026_s3] sm:$0xff]  ;;  %v341_v9 = vld [vmem:[%s298_s29] sm:$0xff]  ;;  %v412_v11 = vld [vmem:[%s1028_s5 + $0x28] sm:$0xff]  ;;  %s456_s8 = scalar_lea.hbm %s1030_s7, %s571_s21  ;;  %s458_s26 = sshll.u32 %s334_s16, 4  ;;  %s459_s26 = int_to_ptr.vmem [resolvable:$true] %s458_s26 }
  0x44   : > { %431 = vmatpush.msra.mxu2 %v414_v7  ;;  %v413_v10 = vld [vmem:[%s1028_s5 + $0x30] sm:$0xff]  ;;  %v336_v12 = vld [vmem:[%s1025_s2] sm:$0xff]  ;;  %v410_v15 = vld [vmem:[%s1028_s5 + $0x18] sm:$0xff]  ;;  %s460_s0 = sshll.u32 %s456_s8, 4  ;;  %s446_s11 = scalar_lea.sflag [#allocation4], %s913_s15  ;;  %s461_s0 = int_to_ptr.hbm [resolvable:$true] %s460_s0 }
  0x45   : > { %394 = vmatpush.msra.mxu1 %v338_v4  ;;  %368 = vmatpush.msra.mxu0 %v343_v5  ;;  %v335_v13 = vld [vmem:[%s288_s30] sm:$0xff]  ;;  %v409_v16 = vld [vmem:[%s1028_s5 + $0x10] sm:$0xff]  ;;  %s701_s28 = sshra.s32 %s461_s0, 4  ;;  %s707_s17 = scalar_lea.hbm %s1030_s7, 16  ;;  %s702_s28 = int_to_ptr.hbm [resolvable:$true] %s701_s28 }
  0x46   : > { %432 = vmatpush.msra.mxu2 %v413_v10  ;;  %v411_v14 = vld [vmem:[%s1028_s5 + $0x20] sm:$0xff]  ;;  %v408_v17 = vld [vmem:[%s1028_s5 + $0x8] sm:$0xff]  ;;  %s703_s30 = scalar_lea.hbm %s702_s28, 8  ;;  %p708_p10 = scmp.lt.s32.totalorder %s702_s28, %s1030_s7 }
  0x47   : > { %395 = vmatpush.msra.mxu1 %v337_v6  ;;  %369 = vmatpush.msra.mxu0 %v342_v8  ;;  %v407_v18 = vld [vmem:[%s1028_s5] sm:$0xff]  ;;  %p704_p6 = scmp.ne.s32.totalorder %s702_s28, %s703_s30  ;;  %p709_p2 = scmp.lt.s32.totalorder %s707_s17, %s703_s30 }
  0x48   : > { %566 = vmatmul.msk.f32.vlgmr.msra.gmra.mxu0 %vm346_vm1, %v341_v9  ;;  %433 = vmatpush.msra.mxu2 %v412_v11  ;;  %v625_v20 = vld [vmem:[%s1027_s4] ss:$0 sm:$0xff] }
  0x49   : > { %396 = vmatpush.msra.mxu1 %v336_v12  ;;  %v626_v25 = vld [vmem:[%s1029_s6] ss:$0 sm:$0xff]  ;;  %p705_p13 = pnand %p704_p6, %p849_p11  ;;  %p710_p9 = por %p709_p2, %p708_p10 }
  0x4a   : > { %568 = vmatmul.msk.f32.vlgmr.msra.gmra.mxu1 %vm374_vm2, %v335_v13  ;;  %434 = vmatpush.msra.mxu2 %v411_v14 }
  0x4b   : > { %p706_p3 = pneg %p705_p13 }
  0x4c   : > { %435 = vmatpush.msra.mxu2 %v410_v15 }
  0x4d   : > { %p711_p0 = pnand %p710_p9, %p706_p3 }
  0x4e   : > { %436 = vmatpush.msra.mxu2 %v409_v16 }
  0x50   : > { %437 = vmatpush.msra.mxu2 %v408_v17 }
  0x52   : > { %438 = vmatpush.msra.mxu2 %v407_v18 }
  0xc5   : > { %v371_v19 = vpop.f32.mrf.mxu0 }
  0xc7   : > { %v398_v21 = vpop.f32.mrf.mxu1 }
  0xc8   : > { %v399_v22 = vadd.f32 %v398_v21, %v371_v19 }
  0xca   : > { %v405_v23 = vadd.f32 %v625_v20, %v399_v22 }
  0xcc   : > { %v406_v24 = vmax.f32 %v405_v23, 0.0 }
  0xce   : > { %569 = vmatmul.msk.f32.vlgmr.msra.gmra.mxu2 %vm419_vm3, %v406_v24 }
 0x151   : > { %v440_v26 = vpop.f32.mrf.mxu2 }
 0x152   : > { %v441_v27 = vadd.f32 %v626_v25, %v440_v26 }
 0x154   : > { %444 = vst.msk [vmem:[%s334_s16] sm:$0xff] %vm443_vm4, %v441_v27 }
 0x155   : > { %714 = shalt.err (!%p711_p0)
}
 0x156   : > { %578 = dma.vmem_to_hbm [thread:$0]  (%p849_p11), %s459_s26, 128, %s461_s0, %s446_s11  }
 0x157 PF: > { %s472_s15 = sand.u32 1, %s745_s24   ;;  %p1045_p1 = scmp.ge.s32.totalorder %s757_s27, 2 }
 0x158   : > { %s473_s22 = scalar_lea.sflag [#allocation4], %s472_s15 }
 0x159   : > { %p588_p4 = pnand %p1045_p1, %p853_p12 }
 0x15b   : > { %p589_p7 = pneg %p588_p4 }
 0x15d   : > { %740 = dma.done.wait (%p589_p7), %s473_s22, 128  }
 0x15e   : > { %742 = vsyncadd (%p589_p7), %s473_s22, 4294967168  ;;  %s1046_s27 = sld [smem:[#allocation12_spill]]  ;;  %s1049_s24 = smov %s749_s25 }
 0x15f   : > { %s1047_s21 = sld [smem:[#allocation11_spill]] }
 0x160   : > { %s1048_s26 = sld [smem:[#allocation13_spill]] }
 0x164   : > { %p23_p5 = scmp.ge.s32.totalorder %s1046_s27, 4  }
 0x165   : > { %s1050_s25 = smov %s1047_s21 }
 0x166   :  { %25 = sbr.rel (!%p23_p5) target bundleno = 9 (0x9), region = 106 }
 0x16b   :  { %479 = vsyncpa [#allocation3], 1 }
 0x16c   :  { %481 = vsyncpa [#allocation3 + $0x1], 1 }
 0x16d   :  { %482 = vsyncpa [#allocation6], 1 }
 0x16e   :  { %484 = vsyncpa [#allocation6 + $0x1], 1 }
 0x16f   :  { %485 = vsyncpa [#allocation4], 1 }
 0x170   :  { %487 = vsyncpa [#allocation4 + $0x1], 1 }

</bundles_post_ra>
